<compile_context>
chip_gen: v7x
topology: tpu7x:2x2x1
jax: 0.10.0
libtpu: 0.0.40
codegen_flags: <defaults>
</compile_context>

<pallas_src>
import functools

import jax
import jax.numpy as jnp
from jax.experimental import pallas as pl
from jax.experimental.pallas import tpu as pltpu

LANES = 128
SUBLANES = 8
MAX_TILE_ROWS = 2048                    # 2048 x 128 x 4 B = 1 MiB per f32 block
VMEM_LIMIT_BYTES = 32 * 1024 * 1024     # 4 inputs x 2 bufs x 1 MiB << 32 MiB


def _loss_kernel(ur_ref, gr_ref, ui_ref, gi_ref, out_ref, acc_r, acc_i, *,
                 tile_rows, valid_rows, inner_tiles, inv_n_real, inv_n_imag,
                 needs_mask):
    p = pl.program_id(0)   # "parallel" slice (megacore-shardable on v7x)
    j = pl.program_id(1)   # sequential row-tile within the slice

    @pl.when(j == 0)
    def _():
        acc_r[...] = jnp.zeros_like(acc_r)
        acc_i[...] = jnp.zeros_like(acc_i)

    dr = ur_ref[...].astype(jnp.float32) - gr_ref[...].astype(jnp.float32)
    di = ui_ref[...].astype(jnp.float32) - gi_ref[...].astype(jnp.float32)

    if needs_mask:
        # Rows beyond the real slab (ragged last tile, or the clamped
        # duplicate tile from an odd split) contribute nothing.  Pure-VALU
        # filler — free under the HBM-bound 4-stream read.
        row = jax.lax.broadcasted_iota(jnp.int32, (tile_rows, LANES), 0)
        tile_idx = p * inner_tiles + j
        valid = (tile_idx * tile_rows + row) < valid_rows
        dr = jnp.where(valid, dr, 0.0)
        di = jnp.where(valid, di, 0.0)

    # Split the sublane-major row axis so the axis-0 sum is a chain of plain
    # vector adds into a single-vreg accumulator (no cross-lane XLU reduce in
    # the steady-state loop).
    sq_r = (dr * dr).reshape(tile_rows // SUBLANES, SUBLANES, LANES)
    sq_i = (di * di).reshape(tile_rows // SUBLANES, SUBLANES, LANES)
    acc_r[...] += jnp.sum(sq_r, axis=0)
    acc_i[...] += jnp.sum(sq_i, axis=0)

    @pl.when(j == inner_tiles - 1)
    def _():
        # Lane-dense (8, 128) scaled partial sum for this slice; the tiny
        # final reduction over sublanes/lanes/slices happens in the wrapper.
        out_ref[...] = acc_r[...] * inv_n_real + acc_i[...] * inv_n_imag


def _round_up(x, m):
    return ((x + m - 1) // m) * m


def _to_slab(x, target_rows):
    """Flatten to a lane-dense (target_rows, 128) slab, keeping the dtype."""
    n = x.size
    flat = x.reshape(-1)
    pad = target_rows * LANES - n
    if pad:
        # Tiny pad only (lane remainder / minimum 8 rows / real-imag size
        # difference); padded zeros contribute 0 to the squared-difference sum.
        flat = jnp.concatenate([flat, jnp.zeros((pad,), dtype=flat.dtype)])
    return flat.reshape(target_rows, LANES)


def helmholtz_loss(u_exact_r, u_exact_i, u_Green_r, u_Green_i):
    assert u_exact_r.shape == u_Green_r.shape
    assert u_exact_i.shape == u_Green_i.shape

    n_real = u_exact_r.size
    n_imag = u_exact_i.size
    # One shared slab geometry for all four streams (real/imag may have
    # different element counts; the smaller pair is zero-padded, which adds
    # exactly zero to its squared-difference sum).
    rows = max(pl.cdiv(n_real, LANES), pl.cdiv(n_imag, LANES), SUBLANES)

    ur = _to_slab(u_exact_r, rows)
    gr = _to_slab(u_Green_r, rows)
    ui = _to_slab(u_exact_i, rows)
    gi = _to_slab(u_Green_i, rows)

    # Balanced, sublane-aligned row tiles: largest tile <= MAX_TILE_ROWS that
    # spreads the rows evenly over the minimal tile count (avoids a nearly
    # empty trailing tile and keeps the two megacore slices load-balanced).
    rows_floor8 = (rows // SUBLANES) * SUBLANES          # rows >= 8 guaranteed
    min_tiles = pl.cdiv(rows, MAX_TILE_ROWS)
    tile_rows = min(_round_up(pl.cdiv(rows, min_tiles), SUBLANES), rows_floor8)
    total_tiles = pl.cdiv(rows, tile_rows)

    # Megacore split: ~2x on v7x (2 TCs per chip), harmless on v5e/v6e.
    num_slices = 2 if total_tiles >= 2 else 1
    inner_tiles = pl.cdiv(total_tiles, num_slices)
    grid_tiles = num_slices * inner_tiles
    needs_mask = (grid_tiles * tile_rows) != rows

    if grid_tiles == total_tiles:
        idx_map = lambda p, j: (p * inner_tiles + j, 0)
    else:
        # Odd tile count split in two: clamp the overflow tile to the last
        # real tile (always an in-bounds DMA); its contribution is masked
        # out inside the kernel.
        idx_map = lambda p, j: (
            jnp.minimum(p * inner_tiles + j, total_tiles - 1), 0)

    kernel = functools.partial(
        _loss_kernel,
        tile_rows=tile_rows,
        valid_rows=rows,
        inner_tiles=inner_tiles,
        inv_n_real=1.0 / float(n_real),
        inv_n_imag=1.0 / float(n_imag),
        needs_mask=needs_mask,
    )

    in_spec = pl.BlockSpec((tile_rows, LANES), idx_map)

    partial = pl.pallas_call(
        kernel,
        out_shape=jax.ShapeDtypeStruct((num_slices * SUBLANES, LANES),
                                       jnp.float32),
        grid_spec=pltpu.PrefetchScalarGridSpec(
            num_scalar_prefetch=0,
            grid=(num_slices, inner_tiles),
            in_specs=[in_spec, in_spec, in_spec, in_spec],
            out_specs=pl.BlockSpec((SUBLANES, LANES), lambda p, j: (p, 0)),
            scratch_shapes=[pltpu.VMEM((SUBLANES, LANES), jnp.float32),
                            pltpu.VMEM((SUBLANES, LANES), jnp.float32)],
        ),
        compiler_params=pltpu.CompilerParams(
            dimension_semantics=("parallel", "arbitrary"),
            vmem_limit_bytes=VMEM_LIMIT_BYTES),
    )(ur, gr, ui, gi)

    # Tiny (<= 16 x 128) final reduce.
    return jnp.sum(partial)


if __name__ == "__main__":
    key = jax.random.PRNGKey(0)

    def ref_loss(ur, ui, gr, gi):
        return jnp.mean((ur - gr) ** 2) + jnp.mean((ui - gi) ** 2)

    # (real_shape, imag_shape) pairs covering every code path:
    test_cases = [
        ((2, 4, 16, 16), (2, 4, 16, 16)),     # small, single-tile path
        ((4, 8, 128, 128), (4, 8, 128, 128)), # 2 tiles, megacore split, no mask
        ((3, 5, 7, 11), (3, 5, 7, 11)),       # ragged lane pad + row mask
        ((2, 4, 16, 16), (2, 4, 12, 12)),     # real/imag sizes differ
        ((5, 8, 128, 103), (5, 8, 128, 103)), # odd tile count -> clamped tile
    ]

    for shape_r, shape_i in test_cases:
        key, k1, k2, k3, k4 = jax.random.split(key, 5)
        u_exact_r = jax.random.normal(k1, shape_r, dtype=jnp.float32)
        u_exact_i = jax.random.normal(k2, shape_i, dtype=jnp.float32)
        u_Green_r = jax.random.normal(k3, shape_r, dtype=jnp.float32)
        u_Green_i = jax.random.normal(k4, shape_i, dtype=jnp.float32)

        loss = helmholtz_loss(u_exact_r, u_exact_i, u_Green_r, u_Green_i)
        jax.block_until_ready(loss)

        ref = ref_loss(u_exact_r, u_exact_i, u_Green_r, u_Green_i)
        assert jnp.allclose(loss, ref, rtol=1e-5, atol=1e-5), \
            (shape_r, shape_i, float(loss), float(ref))

    print("KERNEL_OK")
</pallas_src>

<mosaic_0001>
module attributes {stable_mosaic.version = 11 : i64} {
  func.func @_loss_kernel(%arg0: i32, %arg1: i32, %arg2: memref<16x128xf32, #tpu.memory_space<vmem>>, %arg3: memref<16x128xf32, #tpu.memory_space<vmem>>, %arg4: memref<16x128xf32, #tpu.memory_space<vmem>>, %arg5: memref<16x128xf32, #tpu.memory_space<vmem>>, %arg6: memref<8x128xf32, #tpu.memory_space<vmem>>, %arg7: memref<8x128xf32, #tpu.memory_space<vmem>>, %arg8: memref<8x128xf32, #tpu.memory_space<vmem>>) attributes {dimension_semantics = [#tpu.dimension_semantics<parallel>, #tpu.dimension_semantics<arbitrary>], iteration_bounds = array<i64: 1, 1>, scalar_prefetch = 0 : i64, scratch_operands = 2 : i64, tpu.core_type = #tpu.core_type<tc>, window_params = [{transform_indices = @transform_0, window_bounds = array<i64: 16, 128>}, {transform_indices = @transform_1, window_bounds = array<i64: 16, 128>}, {transform_indices = @transform_2, window_bounds = array<i64: 16, 128>}, {transform_indices = @transform_3, window_bounds = array<i64: 16, 128>}, {transform_indices = @transform_4, window_bounds = array<i64: 8, 128>}]} {
    %c0_i32 = arith.constant 0 : i32
    %0 = arith.cmpi eq, %arg1, %c0_i32 : i32
    %1 = arith.extui %0 : i1 to i32
    %c0_i32_0 = arith.constant 0 : i32
    %2 = arith.cmpi ne, %1, %c0_i32_0 : i32
    scf.if %2 {
      %cst_19 = arith.constant 0.000000e+00 : f32
      %24 = vector.broadcast %cst_19 : f32 to vector<8x128xf32>
      %c0_20 = arith.constant 0 : index
      %c0_21 = arith.constant 0 : index
      %25 = vector.load %arg7[%c0_20, %c0_21] : memref<8x128xf32, #tpu.memory_space<vmem>>, vector<8x128xf32>
      tpu.vector_store %arg7[%c0_20, %c0_21], %24 {strides = array<i32>} : memref<8x128xf32, #tpu.memory_space<vmem>>, vector<8x128xf32>,
      %cst_22 = arith.constant 0.000000e+00 : f32
      %26 = vector.broadcast %cst_22 : f32 to vector<8x128xf32>
      %c0_23 = arith.constant 0 : index
      %c0_24 = arith.constant 0 : index
      %27 = vector.load %arg8[%c0_23, %c0_24] : memref<8x128xf32, #tpu.memory_space<vmem>>, vector<8x128xf32>
      tpu.vector_store %arg8[%c0_23, %c0_24], %26 {strides = array<i32>} : memref<8x128xf32, #tpu.memory_space<vmem>>, vector<8x128xf32>,
    } else {
    }
    %c0 = arith.constant 0 : index
    %c0_1 = arith.constant 0 : index
    %3 = vector.load %arg2[%c0, %c0_1] : memref<16x128xf32, #tpu.memory_space<vmem>>, vector<16x128xf32>
    %c0_2 = arith.constant 0 : index
    %c0_3 = arith.constant 0 : index
    %4 = vector.load %arg3[%c0_2, %c0_3] : memref<16x128xf32, #tpu.memory_space<vmem>>, vector<16x128xf32>
    %5 = arith.subf %3, %4 : vector<16x128xf32>
    %c0_4 = arith.constant 0 : index
    %c0_5 = arith.constant 0 : index
    %6 = vector.load %arg4[%c0_4, %c0_5] : memref<16x128xf32, #tpu.memory_space<vmem>>, vector<16x128xf32>
    %c0_6 = arith.constant 0 : index
    %c0_7 = arith.constant 0 : index
    %7 = vector.load %arg5[%c0_6, %c0_7] : memref<16x128xf32, #tpu.memory_space<vmem>>, vector<16x128xf32>
    %8 = arith.subf %6, %7 : vector<16x128xf32>
    %9 = arith.mulf %5, %5 : vector<16x128xf32>
    %10 = vector.shape_cast %9 : vector<16x128xf32> to vector<2x8x128xf32>
    %11 = arith.mulf %8, %8 : vector<16x128xf32>
    %12 = vector.shape_cast %11 : vector<16x128xf32> to vector<2x8x128xf32>
    %c0_8 = arith.constant 0 : index
    %c0_9 = arith.constant 0 : index
    %13 = vector.load %arg7[%c0_8, %c0_9] : memref<8x128xf32, #tpu.memory_space<vmem>>, vector<8x128xf32>
    %cst = arith.constant dense<0.000000e+00> : vector<8x128xf32>
    %14 = vector.multi_reduction <add>, %10, %cst [0] : vector<2x8x128xf32> to vector<8x128xf32>
    %15 = arith.addf %13, %14 : vector<8x128xf32>
    %c0_10 = arith.constant 0 : index
    %c0_11 = arith.constant 0 : index
    %16 = vector.load %arg7[%c0_10, %c0_11] : memref<8x128xf32, #tpu.memory_space<vmem>>, vector<8x128xf32>
    tpu.vector_store %arg7[%c0_10, %c0_11], %15 {strides = array<i32>} : memref<8x128xf32, #tpu.memory_space<vmem>>, vector<8x128xf32>,
    %c0_12 = arith.constant 0 : index
    %c0_13 = arith.constant 0 : index
    %17 = vector.load %arg8[%c0_12, %c0_13] : memref<8x128xf32, #tpu.memory_space<vmem>>, vector<8x128xf32>
    %cst_14 = arith.constant dense<0.000000e+00> : vector<8x128xf32>
    %18 = vector.multi_reduction <add>, %12, %cst_14 [0] : vector<2x8x128xf32> to vector<8x128xf32>
    %19 = arith.addf %17, %18 : vector<8x128xf32>
    %c0_15 = arith.constant 0 : index
    %c0_16 = arith.constant 0 : index
    %20 = vector.load %arg8[%c0_15, %c0_16] : memref<8x128xf32, #tpu.memory_space<vmem>>, vector<8x128xf32>
    tpu.vector_store %arg8[%c0_15, %c0_16], %19 {strides = array<i32>} : memref<8x128xf32, #tpu.memory_space<vmem>>, vector<8x128xf32>,
    %c0_i32_17 = arith.constant 0 : i32
    %21 = arith.cmpi eq, %arg1, %c0_i32_17 : i32
    %22 = arith.extui %21 : i1 to i32
    %c0_i32_18 = arith.constant 0 : i32
    %23 = arith.cmpi ne, %22, %c0_i32_18 : i32
    scf.if %23 {
      %c0_19 = arith.constant 0 : index
      %c0_20 = arith.constant 0 : index
      %24 = vector.load %arg7[%c0_19, %c0_20] : memref<8x128xf32, #tpu.memory_space<vmem>>, vector<8x128xf32>
      %cst_21 = arith.constant 4.8828125E-4 : f32
      %25 = vector.broadcast %cst_21 : f32 to vector<8x128xf32>
      %26 = arith.mulf %24, %25 : vector<8x128xf32>
      %c0_22 = arith.constant 0 : index
      %c0_23 = arith.constant 0 : index
      %27 = vector.load %arg8[%c0_22, %c0_23] : memref<8x128xf32, #tpu.memory_space<vmem>>, vector<8x128xf32>
      %cst_24 = arith.constant 4.8828125E-4 : f32
      %28 = vector.broadcast %cst_24 : f32 to vector<8x128xf32>
      %29 = arith.mulf %27, %28 : vector<8x128xf32>
      %30 = arith.addf %26, %29 : vector<8x128xf32>
      %c0_25 = arith.constant 0 : index
      %c0_26 = arith.constant 0 : index
      %31 = vector.load %arg6[%c0_25, %c0_26] : memref<8x128xf32, #tpu.memory_space<vmem>>, vector<8x128xf32>
      tpu.vector_store %arg6[%c0_25, %c0_26], %30 {strides = array<i32>} : memref<8x128xf32, #tpu.memory_space<vmem>>, vector<8x128xf32>,
    } else {
    }
    return
  }
  func.func @transform_0(%arg0: i32, %arg1: i32) -> (i32, i32) {
    %c1_i32 = arith.constant 1 : i32
    %0 = arith.muli %arg0, %c1_i32 : i32
    %1 = arith.addi %0, %arg1 : i32
    %c0_i32 = arith.constant 0 : i32
    %c0_i32_0 = arith.constant 0 : i32
    return %1, %c0_i32 : i32, i32
  }
  func.func @transform_1(%arg0: i32, %arg1: i32) -> (i32, i32) {
    %c1_i32 = arith.constant 1 : i32
    %0 = arith.muli %arg0, %c1_i32 : i32
    %1 = arith.addi %0, %arg1 : i32
    %c0_i32 = arith.constant 0 : i32
    %c0_i32_0 = arith.constant 0 : i32
    return %1, %c0_i32 : i32, i32
  }
  func.func @transform_2(%arg0: i32, %arg1: i32) -> (i32, i32) {
    %c1_i32 = arith.constant 1 : i32
    %0 = arith.muli %arg0, %c1_i32 : i32
    %1 = arith.addi %0, %arg1 : i32
    %c0_i32 = arith.constant 0 : i32
    %c0_i32_0 = arith.constant 0 : i32
    return %1, %c0_i32 : i32, i32
  }
  func.func @transform_3(%arg0: i32, %arg1: i32) -> (i32, i32) {
    %c1_i32 = arith.constant 1 : i32
    %0 = arith.muli %arg0, %c1_i32 : i32
    %1 = arith.addi %0, %arg1 : i32
    %c0_i32 = arith.constant 0 : i32
    %c0_i32_0 = arith.constant 0 : i32
    return %1, %c0_i32 : i32, i32
  }
  func.func @transform_4(%arg0: i32, %arg1: i32) -> (i32, i32) {
    %c0_i32 = arith.constant 0 : i32
    %c0_i32_0 = arith.constant 0 : i32
    return %arg0, %c0_i32 : i32, i32
  }
}

</mosaic_0001>

<bundles_post_ra>
// kernel: tpu_custom_call.1
= control target key start
LH: loop header
LB: loop body
LE: loop exit
PB: predicated region body
PF: predicated region fallthrough
CT: control target
= control target key end

     0   :  { %9 = vsyncpa [#allocation5], 0  ;;  %s396_s0 = inlined_call_operand.hbm [shape: f32[16,128], index: 0, kind: input, shape index: {}]   ;;  %s397_s1 = inlined_call_operand.hbm [shape: f32[16,128], index: 1, kind: input, shape index: {}]   ;;  %s398_s2 = inlined_call_operand.hbm [shape: f32[16,128], index: 2, kind: input, shape index: {}]   ;;  %s399_s3 = inlined_call_operand.hbm [shape: f32[16,128], index: 3, kind: input, shape index: {}]   ;;  %s400_s4 = inlined_call_operand.hbm [shape: f32[8,128], index: 4, kind: output, shape index: {}]  }
   0x1   :  { %10 = vsyncpa [#allocation8], 0 }
   0x2   :  { %11 = vsyncpa [#allocation11], 0 }
   0x3   :  { %12 = vsyncpa [#allocation6], 0  ;;  %s278_s15 = smov [#allocation7]   ;;  %s279_s17 = smov [#allocation4]  }
   0x4   :  { %s38_s16 = sshll.u32 %s278_s15, 4  ;;  %s22_s18 = sshll.u32 %s279_s17, 4  ;;  %s39_s16 = int_to_ptr.vmem [resolvable:$true] %s38_s16  ;;  %s310_s18 = int_to_ptr.vmem [resolvable:$true] %s22_s18 }
   0x5   :  { %s160_s21 = scalar_lea.hbm %s397_s1, 256 }
   0x6   :  { %p161_p0 = scmp.ne.s32.totalorder %s397_s1, %s160_s21  ;;  %p164_p1 = scmp.lt.u32.totalorder %s160_s21, %s397_s1 }
   0x8   :  { %p166_p2 = pnand %p164_p1, %p161_p0 }
   0xa   :  { %169 = shalt.err (!%p166_p2)
}
   0xb   :  { %s170_s26 = scalar_lea.vmem %s39_s16, 256  ;;  %p175_p4 = scmp.lt.s32.totalorder %s39_s16, %s39_s16 }
   0xc   :  { %p171_p3 = scmp.ne.s32.totalorder %s39_s16, %s170_s26  ;;  %p176_p5 = scmp.lt.s32.totalorder %s170_s26, %s170_s26 }
   0xe   :  { %p177_p6 = por %p176_p5, %p175_p4 }
  0x10   :  { %p178_p7 = pnand %p177_p6, %p171_p3 }
  0x12   :  { %181 = shalt.err (!%p178_p7)
}
  0x13   :  { %s280_s27 = smov 128   ;;  %s281_s28 = smov 8  }
  0x14   :  { %44 = dma.hbm_to_vmem [thread:$0]  %s397_s1, 256, %s39_s16, [#allocation8], %s280_s27, %s280_s27, %s281_s28  }
  0x15   :  { %s182_s7 = scalar_lea.hbm %s396_s0, 256 }
  0x16   :  { %p183_p8 = scmp.ne.s32.totalorder %s396_s0, %s182_s7  ;;  %p186_p9 = scmp.lt.u32.totalorder %s182_s7, %s396_s0 }
  0x18   :  { %p188_p10 = pnand %p186_p9, %p183_p8 }
  0x1a   :  { %191 = shalt.err (!%p188_p10)
}
  0x1b   :  { %s192_s12 = scalar_lea.vmem %s310_s18, 256  ;;  %p197_p12 = scmp.lt.s32.totalorder %s310_s18, %s310_s18 }
  0x1c   :  { %p193_p11 = scmp.ne.s32.totalorder %s310_s18, %s192_s12  ;;  %p198_p13 = scmp.lt.s32.totalorder %s192_s12, %s192_s12 }
  0x1e   :  { %p199_p0 = por %p198_p13, %p197_p12 }
  0x20   :  { %p200_p1 = pnand %p199_p0, %p193_p11 }
  0x22   :  { %203 = shalt.err (!%p200_p1)
}
  0x23   :  { %28 = dma.hbm_to_vmem [thread:$0]  %s396_s0, 256, %s310_s18, [#allocation5], %s280_s27, %s280_s27, %s281_s28  }
  0x24   :  { %s282_s14 = smov [#allocation9]   ;;  %s283_s16 = smov [#allocation10]  }
  0x25   :  { %s54_s15 = sshll.u32 %s282_s14, 4  ;;  %s70_s17 = sshll.u32 %s283_s16, 4  ;;  %s55_s15 = int_to_ptr.vmem [resolvable:$true] %s54_s15  ;;  %s347_s17 = int_to_ptr.vmem [resolvable:$true] %s70_s17 }
  0x26   :  { %s204_s21 = scalar_lea.hbm %s398_s2, 256 }
  0x27   :  { %p205_p2 = scmp.ne.s32.totalorder %s398_s2, %s204_s21  ;;  %p208_p3 = scmp.lt.u32.totalorder %s204_s21, %s398_s2 }
  0x29   :  { %p210_p4 = pnand %p208_p3, %p205_p2 }
  0x2b   :  { %213 = shalt.err (!%p210_p4)
}
  0x2c   :  { %s214_s0 = scalar_lea.vmem %s55_s15, 256  ;;  %p219_p6 = scmp.lt.s32.totalorder %s55_s15, %s55_s15 }
  0x2d   :  { %p215_p5 = scmp.ne.s32.totalorder %s55_s15, %s214_s0  ;;  %p220_p7 = scmp.lt.s32.totalorder %s214_s0, %s214_s0 }
  0x2f   :  { %p221_p8 = por %p220_p7, %p219_p6 }
  0x31   :  { %p222_p9 = pnand %p221_p8, %p215_p5 }
  0x33   :  { %225 = shalt.err (!%p222_p9)
}
  0x34   :  { %60 = dma.hbm_to_vmem [thread:$0]  %s398_s2, 256, %s55_s15, [#allocation8], %s280_s27, %s280_s27, %s281_s28  }
  0x35   :  { %s226_s5 = scalar_lea.hbm %s399_s3, 256 }
  0x36   :  { %p227_p10 = scmp.ne.s32.totalorder %s399_s3, %s226_s5  ;;  %p230_p11 = scmp.lt.u32.totalorder %s226_s5, %s399_s3 }
  0x38   :  { %p232_p12 = pnand %p230_p11, %p227_p10 }
  0x3a   :  { %235 = shalt.err (!%p232_p12)
}
  0x3b   :  { %s236_s10 = scalar_lea.vmem %s347_s17, 256  ;;  %p241_p0 = scmp.lt.s32.totalorder %s347_s17, %s347_s17 }
  0x3c   :  { %p237_p13 = scmp.ne.s32.totalorder %s347_s17, %s236_s10  ;;  %p242_p1 = scmp.lt.s32.totalorder %s236_s10, %s236_s10 }
  0x3e   :  { %p243_p2 = por %p242_p1, %p241_p0 }
  0x40   :  { %p244_p3 = pnand %p243_p2, %p237_p13 }
  0x42   :  { %247 = shalt.err (!%p244_p3)
}
  0x43   :  { %76 = dma.hbm_to_vmem [thread:$0]  %s399_s3, 256, %s347_s17, [#allocation11], %s280_s27, %s280_s27, %s281_s28  }
  0x44   :  { %270 = dma.done.wait [#allocation5], 256  }
  0x45   :  { %271 = vsyncadd [#allocation5], 4294967040 }
  0x46   :  { %272 = dma.done.wait [#allocation8], 512  }
  0x47   :  { %273 = vsyncadd [#allocation8], 4294966784 }
  0x48   :  { %274 = dma.done.wait [#allocation11], 256  }
  0x49   :  { %275 = vsyncadd [#allocation11], 4294967040  ;;  %v103_v0 = vld [vmem:[#allocation4] sm:$0xff]  ;;  %v104_v1 = vld [vmem:[#allocation4 + $0x8] sm:$0xff]  ;;  %s284_s3 = smov [#allocation12]  }
  0x4a   :  { %v105_v2 = vld [vmem:[#allocation7] sm:$0xff]  ;;  %v106_v3 = vld [vmem:[#allocation7 + $0x8] sm:$0xff]  ;;  %v109_v5 = vld [vmem:[#allocation9] sm:$0xff]  ;;  %s142_s27 = sshll.u32 %s284_s3, 4  ;;  %s143_s27 = int_to_ptr.vmem [resolvable:$true] %s142_s27 }
  0x4b   :  { %v107_v4 = vsub.f32 %v103_v0, %v105_v2  ;;  %v110_v6 = vld [vmem:[#allocation9 + $0x8] sm:$0xff]  ;;  %v108_v7 = vsub.f32 %v104_v1, %v106_v3  ;;  %v111_v8 = vld [vmem:[#allocation10] sm:$0xff]  ;;  %v112_v9 = vld [vmem:[#allocation10 + $0x8] sm:$0xff]  ;;  %s248_s28 = scalar_lea.vmem %s143_s27, 128  ;;  %p253_p5 = scmp.lt.s32.totalorder %s143_s27, %s143_s27 }
  0x4c   :  { %v113_v10 = vsub.f32 %v109_v5, %v111_v8  ;;  %v114_v11 = vsub.f32 %v110_v6, %v112_v9  ;;  %p249_p4 = scmp.ne.s32.totalorder %s143_s27, %s248_s28  ;;  %p254_p6 = scmp.lt.s32.totalorder %s248_s28, %s248_s28 }
  0x4d   :  { %v115_v12 = vmul.f32 %v107_v4, %v107_v4  ;;  %v116_v13 = vmul.f32 %v108_v7, %v108_v7 }
  0x4e   :  { %v117_v14 = vmul.f32 %v113_v10, %v113_v10  ;;  %v118_v15 = vmul.f32 %v114_v11, %v114_v11  ;;  %p255_p7 = por %p254_p6, %p253_p5 }
  0x4f   :  { %v120_v16 = vadd.f32 %v116_v13, %v115_v12 }
  0x50   :  { %v124_v17 = vadd.f32 %v118_v15, %v117_v14  ;;  %p256_p8 = pnand %p255_p7, %p249_p4 }
  0x51   :  { %v131_v18 = vmul.f32 0.00048828125, %v120_v16 }
  0x52   :  { %v133_v19 = vmul.f32 0.00048828125, %v124_v17 }
  0x54   :  { %v134_v20 = vadd.f32 %v133_v19, %v131_v18 }
  0x56   :  { %135 = vst [vmem:[#allocation12] sm:$0xff] %v134_v20 }
  0x57   :  { %259 = shalt.err (!%p256_p8)
}
  0x58   :  { %s260_s13 = scalar_lea.hbm %s400_s4, 128 }
  0x59   :  { %p261_p9 = scmp.ne.s32.totalorder %s400_s4, %s260_s13  ;;  %p264_p10 = scmp.lt.u32.totalorder %s260_s13, %s400_s4 }
  0x5b   :  { %p266_p11 = pnand %p264_p10, %p261_p9 }
  0x5d   :  { %269 = shalt.err (!%p266_p11)
}
  0x5e   :  { %145 = dma.vmem_to_hbm [thread:$0]  %s143_s27, 128, %s400_s4, [#allocation6]  }
  0x5f   :  { %276 = dma.done.wait [#allocation6], 128  }
  0x60   :  { %277 = vsyncadd [#allocation6], 4294967168 }
  0x61   :  { %149 = vsyncpa [#allocation5], 1 }
  0x62   :  { %150 = vsyncpa [#allocation8], 1 }
  0x63   :  { %151 = vsyncpa [#allocation11], 1 }
  0x64   :  { %152 = vsyncpa [#allocation6], 1 }

</bundles_post_ra>
